<compile_context>
chip_gen: v5e
topology: v5e:2x2
jax: 0.10.0
libtpu: 0.0.40
codegen_flags: <defaults>
</compile_context>

<pallas_src>
import jax
import jax.numpy as jnp
from jax.experimental import pallas as pl
from jax.experimental.pallas import tpu as pltpu

H1, H2 = 120, 84
LANE = 128


def _round_up(v, m):
    return (v + m - 1) // m * m


def qnet_kernel(x_ref, w1_ref, b1_ref, w2_ref, b2_ref, w3_ref, b3_ref, o_ref):
    # bf16 operands on the MXU, f32 accumulation; bias add / ReLU in f32 on the VPU.
    x = x_ref[...].astype(jnp.bfloat16)                                  # (tb, obs_dim)
    h1 = jnp.dot(x, w1_ref[...], preferred_element_type=jnp.float32) + b1_ref[...]
    h1 = jnp.maximum(h1, 0.0)
    h2 = jnp.dot(h1.astype(jnp.bfloat16), w2_ref[...],
                 preferred_element_type=jnp.float32) + b2_ref[...]
    h2 = jnp.maximum(h2, 0.0)
    out = jnp.dot(h2.astype(jnp.bfloat16), w3_ref[...],
                  preferred_element_type=jnp.float32) + b3_ref[...]      # (tb, ap), ap small
    o_ref[...] = out.astype(o_ref.dtype)


def init_params(key, obs_dim, n_actions):
    """Canonical f32 params mimicking torch.nn.Linear default init (uniform +/- 1/sqrt(fan_in)).
    Weights stored as [in_features, out_features] so the kernel computes y = x @ W + b."""
    dims = [(obs_dim, H1), (H1, H2), (H2, n_actions)]
    params = []
    for fan_in, fan_out in dims:
        key, kw, kb = jax.random.split(key, 3)
        bound = 1.0 / jnp.sqrt(jnp.float32(fan_in))
        w = jax.random.uniform(kw, (fan_in, fan_out), jnp.float32, -bound, bound)
        b = jax.random.uniform(kb, (1, fan_out), jnp.float32, -bound, bound)
        params.extend([w, b])
    return tuple(params)


def prepare_params(params, obs_dim, n_actions):
    """One-time packing:
       - hidden feature dims (120, 84) zero-padded to 128 (lane-aligned MXU tiles)
       - obs_dim rows of W1 left UNPADDED (x is passed unpadded, K is small and masked on-MXU)
       - action columns padded only to a multiple of 8 (narrow output writeback)
       - weights bf16, biases f32 (added to the f32 accumulator)."""
    w1, b1, w2, b2, w3, b3 = params
    h1p = _round_up(H1, LANE)                 # 128
    h2p = _round_up(H2, LANE)                 # 128
    ap = _round_up(max(n_actions, 8), 8)      # small full-array output width (8 here, not 128)

    def pad_w(w, rp, cp):
        return jnp.pad(w, ((0, rp - w.shape[0]), (0, cp - w.shape[1]))).astype(jnp.bfloat16)

    def pad_b(b, cp):
        return jnp.pad(b, ((0, 0), (0, cp - b.shape[1]))).astype(jnp.float32)

    return (pad_w(w1, obs_dim, h1p), pad_b(b1, h1p),
            pad_w(w2, h1p, h2p),     pad_b(b2, h2p),
            pad_w(w3, h2p, ap),      pad_b(b3, ap))


def qnetwork_forward_pallas(x, padded_params, n_actions, max_batch_tile=1024):
    w1, b1, w2, b2, w3, b3 = padded_params
    B, obs_dim = x.shape
    ap = w3.shape[1]                              # padded action width (multiple of 8, small)

    # --- batch tile selection -----------------------------------------------------------
    # pick tb so it (nearly) divides B (no 25%-garbage-rows padding), and when B is large
    # enough force >=2 tiles so the "parallel" grid axis can shard across v7x's 2 TCs.
    n_tiles = pl.cdiv(B, max_batch_tile)
    if B >= 16:
        n_tiles = max(n_tiles, 2)
    tb = _round_up(pl.cdiv(B, n_tiles), 8)        # sublane-aligned batch tile
    bp = _round_up(B, tb)                         # bp - B < tb (and 0 when tb | B)

    # only the (tiny) batch-dim pad remains; no feature padding, no dtype cast in the wrapper.
    x_in = x if bp == B else jnp.pad(x, ((0, bp - B), (0, 0)))

    def run(single_buffer_weights):
        if single_buffer_weights:
            # constant index_map => fetched once, stays VMEM-resident; single buffer is enough.
            res = lambda a: pl.BlockSpec(a.shape, lambda i: (0, 0),
                                         pipeline_mode=pl.Buffered(1))
        else:
            res = lambda a: pl.BlockSpec(a.shape, lambda i: (0, 0))
        return pl.pallas_call(
            qnet_kernel,
            out_shape=jax.ShapeDtypeStruct((bp, ap), jnp.float32),
            grid=(bp // tb,),
            in_specs=[
                pl.BlockSpec((tb, obs_dim), lambda i: (i, 0)),   # last dim == full dim -> legal
                res(w1), res(b1), res(w2), res(b2), res(w3), res(b3),
            ],
            out_specs=pl.BlockSpec((tb, ap), lambda i: (i, 0)),  # narrow f32 writeback
            compiler_params=pltpu.CompilerParams(
                dimension_semantics=("parallel",)),              # batch tiles across v7x's 2 TCs
        )(x_in, w1, b1, w2, b2, w3, b3)

    try:
        out = run(True)
    except Exception:
        # pipeline_mode=pl.Buffered(1) not supported on this jax build -> default double-buffer.
        out = run(False)

    return out[:B, :n_actions]


def reference_forward_f32(x, params):
    """Pure-f32 reference matching the torch module exactly (also the right acting-path impl)."""
    w1, b1, w2, b2, w3, b3 = params
    h1 = jnp.maximum(x @ w1 + b1, 0.0)
    h2 = jnp.maximum(h1 @ w2 + b2, 0.0)
    return h2 @ w3 + b3


def reference_forward_bf16(x, padded_params, n_actions):
    """Same bf16-operand / f32-accumulate pipeline as the kernel, in plain jnp (tight check)."""
    w1, b1, w2, b2, w3, b3 = padded_params
    xb = x.astype(jnp.bfloat16)
    h1 = jnp.maximum(jnp.dot(xb, w1, preferred_element_type=jnp.float32) + b1, 0.0)
    h2 = jnp.maximum(jnp.dot(h1.astype(jnp.bfloat16), w2,
                             preferred_element_type=jnp.float32) + b2, 0.0)
    out = jnp.dot(h2.astype(jnp.bfloat16), w3, preferred_element_type=jnp.float32) + b3
    return out[:, :n_actions]


if __name__ == "__main__":
    key = jax.random.PRNGKey(0)
    OBS_DIM, N_ACTIONS = 8, 4   # small Box obs flattened to 8, 4 discrete actions

    key, kp = jax.random.split(key)
    params = init_params(kp, OBS_DIM, N_ACTIONS)
    kparams = prepare_params(params, OBS_DIM, N_ACTIONS)

    # tiny acting-style batch (single tile) + replay-style batch (2-tile parallel grid, bp == B)
    for B in (2, 384):
        key, kx = jax.random.split(key)
        x = jax.random.normal(kx, (B, OBS_DIM), jnp.float32)

        out = jax.block_until_ready(qnetwork_forward_pallas(x, kparams, N_ACTIONS))
        assert out.shape == (B, N_ACTIONS)

        ref_bf16 = reference_forward_bf16(x, kparams, N_ACTIONS)
        err_bf16 = jnp.max(jnp.abs(out - ref_bf16))
        assert jnp.allclose(out, ref_bf16, atol=2e-3, rtol=2e-3), f"B={B}: bf16-ref err {err_bf16}"

        ref_f32 = reference_forward_f32(x, params)
        err_f32 = jnp.max(jnp.abs(out - ref_f32))
        assert jnp.allclose(out, ref_f32, atol=5e-2, rtol=5e-2), f"B={B}: f32-ref err {err_f32}"

    print("KERNEL_OK")
</pallas_src>

<mosaic_0001>
module attributes {stable_mosaic.version = 11 : i64} {
  func.func @qnet_kernel(%arg0: i32, %arg1: memref<8x8xf32, #tpu.memory_space<vmem>>, %arg2: memref<8x128xbf16, #tpu.memory_space<vmem>>, %arg3: memref<1x128xf32, #tpu.memory_space<vmem>>, %arg4: memref<128x128xbf16, #tpu.memory_space<vmem>>, %arg5: memref<1x128xf32, #tpu.memory_space<vmem>>, %arg6: memref<128x8xbf16, #tpu.memory_space<vmem>>, %arg7: memref<1x8xf32, #tpu.memory_space<vmem>>, %arg8: memref<8x8xf32, #tpu.memory_space<vmem>>) attributes {dimension_semantics = [#tpu.dimension_semantics<parallel>], iteration_bounds = array<i64: 1>, scalar_prefetch = 0 : i64, scratch_operands = 0 : i64, tpu.core_type = #tpu.core_type<tc>, window_params = [{transform_indices = @transform_0, window_bounds = array<i64: 8, 8>}, {pipeline_mode = #tpu.pipeline_mode<synchronous>, transform_indices = @transform_1, window_bounds = array<i64: 8, 128>}, {pipeline_mode = #tpu.pipeline_mode<synchronous>, transform_indices = @transform_2, window_bounds = array<i64: 1, 128>}, {pipeline_mode = #tpu.pipeline_mode<synchronous>, transform_indices = @transform_3, window_bounds = array<i64: 128, 128>}, {pipeline_mode = #tpu.pipeline_mode<synchronous>, transform_indices = @transform_4, window_bounds = array<i64: 1, 128>}, {pipeline_mode = #tpu.pipeline_mode<synchronous>, transform_indices = @transform_5, window_bounds = array<i64: 128, 8>}, {pipeline_mode = #tpu.pipeline_mode<synchronous>, transform_indices = @transform_6, window_bounds = array<i64: 1, 8>}, {transform_indices = @transform_7, window_bounds = array<i64: 8, 8>}]} {
    %c0 = arith.constant 0 : index
    %c0_0 = arith.constant 0 : index
    %0 = vector.load %arg1[%c0, %c0_0] : memref<8x8xf32, #tpu.memory_space<vmem>>, vector<8x8xf32>
    %1 = arith.truncf %0 : vector<8x8xf32> to vector<8x8xbf16>
    %c0_1 = arith.constant 0 : index
    %c0_2 = arith.constant 0 : index
    %2 = vector.load %arg2[%c0_1, %c0_2] : memref<8x128xbf16, #tpu.memory_space<vmem>>, vector<8x128xbf16>
    %cst = arith.constant dense<0.000000e+00> : vector<8x128xf32>
    %3 = tpu.matmul %1, %2, %cst {dimension_numbers = #tpu.dot_dimension_numbers<[1], [0], [0], [1], [0, 0, 1, 1], [], []>} : vector<8x8xbf16>, vector<8x128xbf16>, vector<8x128xf32> -> vector<8x128xf32>
    %c0_3 = arith.constant 0 : index
    %c0_4 = arith.constant 0 : index
    %4 = vector.load %arg3[%c0_3, %c0_4] : memref<1x128xf32, #tpu.memory_space<vmem>>, vector<1x128xf32>
    %5 = vector.broadcast %4 : vector<1x128xf32> to vector<8x128xf32>
    %6 = arith.addf %3, %5 : vector<8x128xf32>
    %cst_5 = arith.constant 0.000000e+00 : f32
    %7 = vector.broadcast %cst_5 : f32 to vector<8x128xf32>
    %8 = arith.maximumf %6, %7 : vector<8x128xf32>
    %9 = arith.truncf %8 : vector<8x128xf32> to vector<8x128xbf16>
    %c0_6 = arith.constant 0 : index
    %c0_7 = arith.constant 0 : index
    %10 = vector.load %arg4[%c0_6, %c0_7] : memref<128x128xbf16, #tpu.memory_space<vmem>>, vector<128x128xbf16>
    %cst_8 = arith.constant dense<0.000000e+00> : vector<8x128xf32>
    %11 = tpu.matmul %9, %10, %cst_8 {dimension_numbers = #tpu.dot_dimension_numbers<[1], [0], [0], [1], [0, 0, 1, 1], [], []>} : vector<8x128xbf16>, vector<128x128xbf16>, vector<8x128xf32> -> vector<8x128xf32>
    %c0_9 = arith.constant 0 : index
    %c0_10 = arith.constant 0 : index
    %12 = vector.load %arg5[%c0_9, %c0_10] : memref<1x128xf32, #tpu.memory_space<vmem>>, vector<1x128xf32>
    %13 = vector.broadcast %12 : vector<1x128xf32> to vector<8x128xf32>
    %14 = arith.addf %11, %13 : vector<8x128xf32>
    %cst_11 = arith.constant 0.000000e+00 : f32
    %15 = vector.broadcast %cst_11 : f32 to vector<8x128xf32>
    %16 = arith.maximumf %14, %15 : vector<8x128xf32>
    %17 = arith.truncf %16 : vector<8x128xf32> to vector<8x128xbf16>
    %c0_12 = arith.constant 0 : index
    %c0_13 = arith.constant 0 : index
    %18 = vector.load %arg6[%c0_12, %c0_13] : memref<128x8xbf16, #tpu.memory_space<vmem>>, vector<128x8xbf16>
    %cst_14 = arith.constant dense<0.000000e+00> : vector<8x8xf32>
    %19 = tpu.matmul %17, %18, %cst_14 {dimension_numbers = #tpu.dot_dimension_numbers<[1], [0], [0], [1], [0, 0, 1, 1], [], []>} : vector<8x128xbf16>, vector<128x8xbf16>, vector<8x8xf32> -> vector<8x8xf32>
    %c0_15 = arith.constant 0 : index
    %c0_16 = arith.constant 0 : index
    %20 = vector.load %arg7[%c0_15, %c0_16] : memref<1x8xf32, #tpu.memory_space<vmem>>, vector<1x8xf32>
    %21 = vector.broadcast %20 : vector<1x8xf32> to vector<8x8xf32>
    %22 = arith.addf %19, %21 : vector<8x8xf32>
    %c0_17 = arith.constant 0 : index
    %c0_18 = arith.constant 0 : index
    %23 = vector.load %arg8[%c0_17, %c0_18] : memref<8x8xf32, #tpu.memory_space<vmem>>, vector<8x8xf32>
    tpu.vector_store %arg8[%c0_17, %c0_18], %22 {strides = array<i32>} : memref<8x8xf32, #tpu.memory_space<vmem>>, vector<8x8xf32>,
    return
  }
  func.func @transform_0(%arg0: i32) -> (i32, i32) {
    %c0_i32 = arith.constant 0 : i32
    %c0_i32_0 = arith.constant 0 : i32
    return %arg0, %c0_i32 : i32, i32
  }
  func.func @transform_1(%arg0: i32) -> (i32, i32) {
    %c0_i32 = arith.constant 0 : i32
    %c0_i32_0 = arith.constant 0 : i32
    %c0_i32_1 = arith.constant 0 : i32
    return %c0_i32, %c0_i32_0 : i32, i32
  }
  func.func @transform_2(%arg0: i32) -> (i32, i32) {
    %c0_i32 = arith.constant 0 : i32
    %c0_i32_0 = arith.constant 0 : i32
    %c0_i32_1 = arith.constant 0 : i32
    return %c0_i32, %c0_i32_0 : i32, i32
  }
  func.func @transform_3(%arg0: i32) -> (i32, i32) {
    %c0_i32 = arith.constant 0 : i32
    %c0_i32_0 = arith.constant 0 : i32
    %c0_i32_1 = arith.constant 0 : i32
    return %c0_i32, %c0_i32_0 : i32, i32
  }
  func.func @transform_4(%arg0: i32) -> (i32, i32) {
    %c0_i32 = arith.constant 0 : i32
    %c0_i32_0 = arith.constant 0 : i32
    %c0_i32_1 = arith.constant 0 : i32
    return %c0_i32, %c0_i32_0 : i32, i32
  }
  func.func @transform_5(%arg0: i32) -> (i32, i32) {
    %c0_i32 = arith.constant 0 : i32
    %c0_i32_0 = arith.constant 0 : i32
    %c0_i32_1 = arith.constant 0 : i32
    return %c0_i32, %c0_i32_0 : i32, i32
  }
  func.func @transform_6(%arg0: i32) -> (i32, i32) {
    %c0_i32 = arith.constant 0 : i32
    %c0_i32_0 = arith.constant 0 : i32
    %c0_i32_1 = arith.constant 0 : i32
    return %c0_i32, %c0_i32_0 : i32, i32
  }
  func.func @transform_7(%arg0: i32) -> (i32, i32) {
    %c0_i32 = arith.constant 0 : i32
    %c0_i32_0 = arith.constant 0 : i32
    return %arg0, %c0_i32 : i32, i32
  }
}

module attributes {stable_mosaic.version = 11 : i64} {
  func.func @qnet_kernel(%arg0: i32, %arg1: memref<8x8xf32, #tpu.memory_space<vmem>>, %arg2: memref<8x128xbf16, #tpu.memory_space<vmem>>, %arg3: memref<1x128xf32, #tpu.memory_space<vmem>>, %arg4: memref<128x128xbf16, #tpu.memory_space<vmem>>, %arg5: memref<1x128xf32, #tpu.memory_space<vmem>>, %arg6: memref<128x8xbf16, #tpu.memory_space<vmem>>, %arg7: memref<1x8xf32, #tpu.memory_space<vmem>>, %arg8: memref<8x8xf32, #tpu.memory_space<vmem>>) attributes {dimension_semantics = [#tpu.dimension_semantics<parallel>], iteration_bounds = array<i64: 1>, scalar_prefetch = 0 : i64, scratch_operands = 0 : i64, tpu.core_type = #tpu.core_type<tc>, window_params = [{transform_indices = @transform_0, window_bounds = array<i64: 8, 8>}, {pipeline_mode = #tpu.pipeline_mode<synchronous>, transform_indices = @transform_1, window_bounds = array<i64: 8, 128>}, {pipeline_mode = #tpu.pipeline_mode<synchronous>, transform_indices = @transform_2, window_bounds = array<i64: 1, 128>}, {pipeline_mode = #tpu.pipeline_mode<synchronous>, transform_indices = @transform_3, window_bounds = array<i64: 128, 128>}, {pipeline_mode = #tpu.pipeline_mode<synchronous>, transform_indices = @transform_4, window_bounds = array<i64: 1, 128>}, {pipeline_mode = #tpu.pipeline_mode<synchronous>, transform_indices = @transform_5, window_bounds = array<i64: 128, 8>}, {pipeline_mode = #tpu.pipeline_mode<synchronous>, transform_indices = @transform_6, window_bounds = array<i64: 1, 8>}, {transform_indices = @transform_7, window_bounds = array<i64: 8, 8>}]} {
    %c0 = arith.constant 0 : index
    %c0_0 = arith.constant 0 : index
    %0 = vector.load %arg1[%c0, %c0_0] : memref<8x8xf32, #tpu.memory_space<vmem>>, vector<8x8xf32>
    %1 = arith.truncf %0 : vector<8x8xf32> to vector<8x8xbf16>
    %c0_1 = arith.constant 0 : index
    %c0_2 = arith.constant 0 : index
    %2 = vector.load %arg2[%c0_1, %c0_2] : memref<8x128xbf16, #tpu.memory_space<vmem>>, vector<8x128xbf16>
    %cst = arith.constant dense<0.000000e+00> : vector<8x128xf32>
    %3 = tpu.matmul %1, %2, %cst {dimension_numbers = #tpu.dot_dimension_numbers<[1], [0], [0], [1], [0, 0, 1, 1], [], []>} : vector<8x8xbf16>, vector<8x128xbf16>, vector<8x128xf32> -> vector<8x128xf32>
    %c0_3 = arith.constant 0 : index
    %c0_4 = arith.constant 0 : index
    %4 = vector.load %arg3[%c0_3, %c0_4] : memref<1x128xf32, #tpu.memory_space<vmem>>, vector<1x128xf32>
    %5 = vector.broadcast %4 : vector<1x128xf32> to vector<8x128xf32>
    %6 = arith.addf %3, %5 : vector<8x128xf32>
    %cst_5 = arith.constant 0.000000e+00 : f32
    %7 = vector.broadcast %cst_5 : f32 to vector<8x128xf32>
    %8 = arith.maximumf %6, %7 : vector<8x128xf32>
    %9 = arith.truncf %8 : vector<8x128xf32> to vector<8x128xbf16>
    %c0_6 = arith.constant 0 : index
    %c0_7 = arith.constant 0 : index
    %10 = vector.load %arg4[%c0_6, %c0_7] : memref<128x128xbf16, #tpu.memory_space<vmem>>, vector<128x128xbf16>
    %cst_8 = arith.constant dense<0.000000e+00> : vector<8x128xf32>
    %11 = tpu.matmul %9, %10, %cst_8 {dimension_numbers = #tpu.dot_dimension_numbers<[1], [0], [0], [1], [0, 0, 1, 1], [], []>} : vector<8x128xbf16>, vector<128x128xbf16>, vector<8x128xf32> -> vector<8x128xf32>
    %c0_9 = arith.constant 0 : index
    %c0_10 = arith.constant 0 : index
    %12 = vector.load %arg5[%c0_9, %c0_10] : memref<1x128xf32, #tpu.memory_space<vmem>>, vector<1x128xf32>
    %13 = vector.broadcast %12 : vector<1x128xf32> to vector<8x128xf32>
    %14 = arith.addf %11, %13 : vector<8x128xf32>
    %cst_11 = arith.constant 0.000000e+00 : f32
    %15 = vector.broadcast %cst_11 : f32 to vector<8x128xf32>
    %16 = arith.maximumf %14, %15 : vector<8x128xf32>
    %17 = arith.truncf %16 : vector<8x128xf32> to vector<8x128xbf16>
    %c0_12 = arith.constant 0 : index
    %c0_13 = arith.constant 0 : index
    %18 = vector.load %arg6[%c0_12, %c0_13] : memref<128x8xbf16, #tpu.memory_space<vmem>>, vector<128x8xbf16>
    %cst_14 = arith.constant dense<0.000000e+00> : vector<8x8xf32>
    %19 = tpu.matmul %17, %18, %cst_14 {dimension_numbers = #tpu.dot_dimension_numbers<[1], [0], [0], [1], [0, 0, 1, 1], [], []>} : vector<8x128xbf16>, vector<128x8xbf16>, vector<8x8xf32> -> vector<8x8xf32>
    %c0_15 = arith.constant 0 : index
    %c0_16 = arith.constant 0 : index
    %20 = vector.load %arg7[%c0_15, %c0_16] : memref<1x8xf32, #tpu.memory_space<vmem>>, vector<1x8xf32>
    %21 = vector.broadcast %20 : vector<1x8xf32> to vector<8x8xf32>
    %22 = arith.addf %19, %21 : vector<8x8xf32>
    %c0_17 = arith.constant 0 : index
    %c0_18 = arith.constant 0 : index
    %23 = vector.load %arg8[%c0_17, %c0_18] : memref<8x8xf32, #tpu.memory_space<vmem>>, vector<8x8xf32>
    tpu.vector_store %arg8[%c0_17, %c0_18], %22 {strides = array<i32>} : memref<8x8xf32, #tpu.memory_space<vmem>>, vector<8x8xf32>,
    return
  }
  func.func @transform_0(%arg0: i32) -> (i32, i32) {
    %c0_i32 = arith.constant 0 : i32
    %c0_i32_0 = arith.constant 0 : i32
    return %arg0, %c0_i32 : i32, i32
  }
  func.func @transform_1(%arg0: i32) -> (i32, i32) {
    %c0_i32 = arith.constant 0 : i32
    %c0_i32_0 = arith.constant 0 : i32
    %c0_i32_1 = arith.constant 0 : i32
    return %c0_i32, %c0_i32_0 : i32, i32
  }
  func.func @transform_2(%arg0: i32) -> (i32, i32) {
    %c0_i32 = arith.constant 0 : i32
    %c0_i32_0 = arith.constant 0 : i32
    %c0_i32_1 = arith.constant 0 : i32
    return %c0_i32, %c0_i32_0 : i32, i32
  }
  func.func @transform_3(%arg0: i32) -> (i32, i32) {
    %c0_i32 = arith.constant 0 : i32
    %c0_i32_0 = arith.constant 0 : i32
    %c0_i32_1 = arith.constant 0 : i32
    return %c0_i32, %c0_i32_0 : i32, i32
  }
  func.func @transform_4(%arg0: i32) -> (i32, i32) {
    %c0_i32 = arith.constant 0 : i32
    %c0_i32_0 = arith.constant 0 : i32
    %c0_i32_1 = arith.constant 0 : i32
    return %c0_i32, %c0_i32_0 : i32, i32
  }
  func.func @transform_5(%arg0: i32) -> (i32, i32) {
    %c0_i32 = arith.constant 0 : i32
    %c0_i32_0 = arith.constant 0 : i32
    %c0_i32_1 = arith.constant 0 : i32
    return %c0_i32, %c0_i32_0 : i32, i32
  }
  func.func @transform_6(%arg0: i32) -> (i32, i32) {
    %c0_i32 = arith.constant 0 : i32
    %c0_i32_0 = arith.constant 0 : i32
    %c0_i32_1 = arith.constant 0 : i32
    return %c0_i32, %c0_i32_0 : i32, i32
  }
  func.func @transform_7(%arg0: i32) -> (i32, i32) {
    %c0_i32 = arith.constant 0 : i32
    %c0_i32_0 = arith.constant 0 : i32
    return %arg0, %c0_i32 : i32, i32
  }
}

</mosaic_0001>

<bundles_post_ra>
// kernel: tpu_custom_call.1
= control target key start
LH: loop header
LB: loop body
LE: loop exit
PB: predicated region body
PF: predicated region fallthrough
CT: control target
= control target key end

     0   :  { %12 = vsyncpa [#allocation3], 0  ;;  %s584_s0 = inlined_call_operand.hbm [shape: f32[8,8], index: 0, kind: input, shape index: {}]   ;;  %s585_s1 = inlined_call_operand.vmem [shape: bf16[8,128], index: 1, kind: input, shape index: {}]   ;;  %s586_s2 = inlined_call_operand.hbm [shape: f32[1,128], index: 2, kind: input, shape index: {}]   ;;  %s587_s3 = inlined_call_operand.vmem [shape: bf16[128,128], index: 3, kind: input, shape index: {}]   ;;  %s588_s4 = inlined_call_operand.hbm [shape: f32[1,128], index: 4, kind: input, shape index: {}]   ;;  %s589_s5 = inlined_call_operand.vmem [shape: bf16[128,8], index: 5, kind: input, shape index: {}]   ;;  %s590_s6 = inlined_call_operand.vmem [shape: f32[1,8], index: 6, kind: input, shape index: {}]   ;;  %s591_s7 = inlined_call_operand.hbm [shape: f32[8,8], index: 7, kind: output, shape index: {}]  }
   0x1   :  { %13 = vsyncpa [#allocation6], 0  ;;  %s33_s26 = sshll.u32 %s586_s2, 4  ;;  %s34_s26 = int_to_ptr.hbm [resolvable:$true] %s33_s26 }
   0x2   :  { %14 = vsyncpa [#allocation4], 0  ;;  %s472_s27 = smov [#allocation5]   ;;  %s20_s8 = sshll.u32 %s584_s0, 4  ;;  %s21_s8 = int_to_ptr.hbm [resolvable:$true] %s20_s8 }
   0x3   :  { %s35_s28 = sshll.u32 %s472_s27, 4  ;;  %s473_s9 = smov [#allocation2]   ;;  %s36_s28 = int_to_ptr.vmem [resolvable:$true] %s35_s28 }
   0x4   :  { %38 = dma.hbm_to_vmem [thread:$0]  %s34_s26, 16, %s36_s28, [#allocation6]  }
   0x5   :  { %s22_s10 = sshll.u32 %s473_s9, 4  ;;  %s46_s13 = sshll.u32 %s588_s4, 4  ;;  %s23_s10 = int_to_ptr.vmem [resolvable:$true] %s22_s10  ;;  %s47_s13 = int_to_ptr.hbm [resolvable:$true] %s46_s13 }
   0x6   :  { %25 = dma.hbm_to_vmem [thread:$0]  %s21_s8, 128, %s23_s10, [#allocation3]  }
   0x7   :  { %s474_s2 = smov [#allocation7]  }
   0x8   :  { %s48_s14 = sshll.u32 %s474_s2, 4  ;;  %s49_s14 = int_to_ptr.vmem [resolvable:$true] %s48_s14 }
   0x9   :  { %51 = dma.hbm_to_vmem [thread:$0]  %s47_s13, 16, %s49_s14, [#allocation6]  }
   0xa   :  { %466 = dma.done.wait [#allocation3], 128  }
   0xb   :  { %467 = vsyncadd [#allocation3], 4294967168 }
   0xc   :  { %468 = dma.done.wait [#allocation6], 32  }
   0xd   :  { %469 = vsyncadd [#allocation6], 4294967264  ;;  %vm80_vm0 = vcmask 1043456   ;;  %v71_v0 = vld [vmem:[%s585_s1] sm:$0xf]  ;;  %v354_v2 = vld [vmem:[%s587_s3 + $0x38] sm:$0xff] }
   0xe   :  { %v69_v1 = vld [vmem:[#allocation2] sm:$0xff]  ;;  %v82_v3 = vsel %vm80_vm0, %v71_v0, 0  ;;  %vm76_vm1 = vcmask 64512   ;;  %167 = vmatpush.bf16.msra.mxu1 %v354_v2  ;;  %v353_v5 = vld [vmem:[%s587_s3 + $0x30] sm:$0xff]  ;;  %v352_v6 = vld [vmem:[%s587_s3 + $0x28] sm:$0xff]  ;;  %s475_s1 = smov [#allocation8]  }
   0xf   :  { %v70_v4 = vpack.c.bf16 %v69_v1, %v69_v1  ;;  %91 = vmatpush.bf16.msra.mxu0 %v82_v3  ;;  %v351_v7 = vld [vmem:[%s587_s3 + $0x20] sm:$0xff]  ;;  %v350_v8 = vld [vmem:[%s587_s3 + $0x18] sm:$0xff]  ;;  %v349_v9 = vld [vmem:[%s587_s3 + $0x10] sm:$0xff]  ;;  %s269_s21 = sshll.u32 %s475_s1, 4  ;;  %s271_s24 = sshll.u32 %s591_s7, 4  ;;  %s270_s21 = int_to_ptr.vmem [resolvable:$true] %s269_s21  ;;  %s272_s24 = int_to_ptr.hbm [resolvable:$true] %s271_s24 }
  0x10   :  { %v348_v10 = vld [vmem:[%s587_s3 + $0x8] sm:$0xff]  ;;  %v347_v11 = vld [vmem:[%s587_s3] sm:$0xff]  ;;  %v362_v12 = vld [vmem:[%s589_s5 + $0x38] sm:$0xff] }
  0x11   :  { %250 = vmatpush.bf16.msra.mxu2 %v362_v12  ;;  %v361_v13 = vld [vmem:[%s589_s5 + $0x30] sm:$0xff]  ;;  %v360_v14 = vld [vmem:[%s589_s5 + $0x28] sm:$0xff]  ;;  %v359_v15 = vld [vmem:[%s589_s5 + $0x20] sm:$0xff] }
  0x12   :  { %282 = vmatmul.msk.bf16.vlgmr.msra.gmra.mxu0 %vm76_vm1, %v70_v4  ;;  %168 = vmatpush.bf16.msra.mxu1 %v353_v5  ;;  %v358_v16 = vld [vmem:[%s589_s5 + $0x18] sm:$0xff]  ;;  %v357_v17 = vld [vmem:[%s589_s5 + $0x10] sm:$0xff]  ;;  %v367_v18 = vld [vmem:[#allocation5] ss:$0 sm:$0xff] }
  0x13   :  { %v356_v24 = vld [vmem:[%s589_s5 + $0x8] sm:$0xff]  ;;  %v355_v25 = vld [vmem:[%s589_s5] sm:$0xff] }
  0x14   :  { %v368_v26 = vld [vmem:[#allocation7] ss:$0 sm:$0xff]  ;;  %v369_v32 = vld [vmem:[%s590_s6] ss:$0 sm:$0xff] }
  0x15   :  { %251 = vmatpush.bf16.msra.mxu2 %v361_v13 }
  0x16   :  { %169 = vmatpush.bf16.msra.mxu1 %v352_v6 }
  0x19   :  { %252 = vmatpush.bf16.msra.mxu2 %v360_v14 }
  0x1a   :  { %170 = vmatpush.bf16.msra.mxu1 %v351_v7 }
  0x1d   :  { %253 = vmatpush.bf16.msra.mxu2 %v359_v15 }
  0x1e   :  { %171 = vmatpush.bf16.msra.mxu1 %v350_v8 }
  0x21   :  { %254 = vmatpush.bf16.msra.mxu2 %v358_v16 }
  0x22   :  { %172 = vmatpush.bf16.msra.mxu1 %v349_v9 }
  0x25   :  { %255 = vmatpush.bf16.msra.mxu2 %v357_v17 }
  0x26   :  { %173 = vmatpush.bf16.msra.mxu1 %v348_v10 }
  0x29   :  { %256 = vmatpush.bf16.msra.mxu2 %v356_v24 }
  0x2a   :  { %174 = vmatpush.bf16.msra.mxu1 %v347_v11 }
  0x2d   :  { %257 = vmatpush.bf16.msra.mxu2 %v355_v25 }
  0x8f   :  { %v93_v19 = vpop.f32.mrf.mxu0 }
  0x90   :  { %v94_v20 = vadd.f32 %v367_v18, %v93_v19 }
  0x92   :  { %v97_v21 = vmax.f32 %v94_v20, 0.0 }
  0x94   :  { %v98_v22 = vpack.c.bf16 %v97_v21, %v97_v21 }
  0x96   :  { %175 = vmatmul.bf16.vlgmr.msra.gmra.mxu1 %v98_v22 }
  0x97   :  { %v95_v23 = vpop.f32.mrf.mxu0 }
 0x113   :  { %v176_v27 = vpop.f32.mrf.mxu1 }
 0x114   :  { %v177_v28 = vadd.f32 %v368_v26, %v176_v27 }
 0x116   :  { %v180_v29 = vmax.f32 %v177_v28, 0.0 }
 0x118   :  { %v181_v30 = vpack.c.bf16 %v180_v29, %v180_v29 }
 0x11a   :  { %258 = vmatmul.bf16.vlgmr.msra.gmra.mxu2 %v181_v30 }
 0x11b   :  { %v178_v31 = vpop.f32.mrf.mxu1 }
 0x19d   :  { %v259_v33 = vpop.f32.mrf.mxu2 }
 0x19e   :  { %v260_v34 = vadd.f32 %v369_v32, %v259_v33 }
 0x1a0   :  { %263 = vst.msk [vmem:[#allocation8] sm:$0xff] %vm76_vm1, %v260_v34 }
 0x1a1   :  { %274 = dma.vmem_to_hbm [thread:$0]  %s270_s21, 128, %s272_s24, [#allocation4]  }
 0x1a5   :  { %v261_v35 = vpop.f32.mrf.mxu2 }
 0x1a6   :  { %470 = dma.done.wait [#allocation4], 128  }
 0x1a7   :  { %471 = vsyncadd [#allocation4], 4294967168 }
 0x1a8   :  { %279 = vsyncpa [#allocation3], 1 }
 0x1a9   :  { %280 = vsyncpa [#allocation6], 1 }
 0x1aa   :  { %281 = vsyncpa [#allocation4], 1 }

// kernel: tpu_custom_call.1
= control target key start
LH: loop header
LB: loop body
LE: loop exit
PB: predicated region body
PF: predicated region fallthrough
CT: control target
= control target key end

     0   :  { %12 = vsyncpa [#allocation3], 0  ;;  %s584_s0 = inlined_call_operand.hbm [shape: f32[8,8], index: 0, kind: input, shape index: {}]   ;;  %s585_s1 = inlined_call_operand.vmem [shape: bf16[8,128], index: 1, kind: input, shape index: {}]   ;;  %s586_s2 = inlined_call_operand.hbm [shape: f32[1,128], index: 2, kind: input, shape index: {}]   ;;  %s587_s3 = inlined_call_operand.vmem [shape: bf16[128,128], index: 3, kind: input, shape index: {}]   ;;  %s588_s4 = inlined_call_operand.hbm [shape: f32[1,128], index: 4, kind: input, shape index: {}]   ;;  %s589_s5 = inlined_call_operand.vmem [shape: bf16[128,8], index: 5, kind: input, shape index: {}]   ;;  %s590_s6 = inlined_call_operand.vmem [shape: f32[1,8], index: 6, kind: input, shape index: {}]   ;;  %s591_s7 = inlined_call_operand.hbm [shape: f32[8,8], index: 7, kind: output, shape index: {}]  }
   0x1   :  { %13 = vsyncpa [#allocation6], 0  ;;  %s33_s26 = sshll.u32 %s586_s2, 4  ;;  %s34_s26 = int_to_ptr.hbm [resolvable:$true] %s33_s26 }
   0x2   :  { %14 = vsyncpa [#allocation4], 0  ;;  %s472_s27 = smov [#allocation5]   ;;  %s20_s8 = sshll.u32 %s584_s0, 4  ;;  %s21_s8 = int_to_ptr.hbm [resolvable:$true] %s20_s8 }
   0x3   :  { %s35_s28 = sshll.u32 %s472_s27, 4  ;;  %s473_s9 = smov [#allocation2]   ;;  %s36_s28 = int_to_ptr.vmem [resolvable:$true] %s35_s28 }
   0x4   :  { %38 = dma.hbm_to_vmem [thread:$0]  %s34_s26, 16, %s36_s28, [#allocation6]  }
   0x5   :  { %s22_s10 = sshll.u32 %s473_s9, 4  ;;  %s46_s13 = sshll.u32 %s588_s4, 4  ;;  %s23_s10 = int_to_ptr.vmem [resolvable:$true] %s22_s10  ;;  %s47_s13 = int_to_ptr.hbm [resolvable:$true] %s46_s13 }
   0x6   :  { %25 = dma.hbm_to_vmem [thread:$0]  %s21_s8, 128, %s23_s10, [#allocation3]  }
   0x7   :  { %s474_s2 = smov [#allocation7]  }
   0x8   :  { %s48_s14 = sshll.u32 %s474_s2, 4  ;;  %s49_s14 = int_to_ptr.vmem [resolvable:$true] %s48_s14 }
   0x9   :  { %51 = dma.hbm_to_vmem [thread:$0]  %s47_s13, 16, %s49_s14, [#allocation6]  }
   0xa   :  { %466 = dma.done.wait [#allocation3], 128  }
   0xb   :  { %467 = vsyncadd [#allocation3], 4294967168 }
   0xc   :  { %468 = dma.done.wait [#allocation6], 32  }
   0xd   :  { %469 = vsyncadd [#allocation6], 4294967264  ;;  %vm80_vm0 = vcmask 1043456   ;;  %v71_v0 = vld [vmem:[%s585_s1] sm:$0xf]  ;;  %v354_v2 = vld [vmem:[%s587_s3 + $0x38] sm:$0xff] }
   0xe   :  { %v69_v1 = vld [vmem:[#allocation2] sm:$0xff]  ;;  %v82_v3 = vsel %vm80_vm0, %v71_v0, 0  ;;  %vm76_vm1 = vcmask 64512   ;;  %167 = vmatpush.bf16.msra.mxu1 %v354_v2  ;;  %v353_v5 = vld [vmem:[%s587_s3 + $0x30] sm:$0xff]  ;;  %v352_v6 = vld [vmem:[%s587_s3 + $0x28] sm:$0xff]  ;;  %s475_s1 = smov [#allocation8]  }
   0xf   :  { %v70_v4 = vpack.c.bf16 %v69_v1, %v69_v1  ;;  %91 = vmatpush.bf16.msra.mxu0 %v82_v3  ;;  %v351_v7 = vld [vmem:[%s587_s3 + $0x20] sm:$0xff]  ;;  %v350_v8 = vld [vmem:[%s587_s3 + $0x18] sm:$0xff]  ;;  %v349_v9 = vld [vmem:[%s587_s3 + $0x10] sm:$0xff]  ;;  %s269_s21 = sshll.u32 %s475_s1, 4  ;;  %s271_s24 = sshll.u32 %s591_s7, 4  ;;  %s270_s21 = int_to_ptr.vmem [resolvable:$true] %s269_s21  ;;  %s272_s24 = int_to_ptr.hbm [resolvable:$true] %s271_s24 }
  0x10   :  { %v348_v10 = vld [vmem:[%s587_s3 + $0x8] sm:$0xff]  ;;  %v347_v11 = vld [vmem:[%s587_s3] sm:$0xff]  ;;  %v362_v12 = vld [vmem:[%s589_s5 + $0x38] sm:$0xff] }
  0x11   :  { %250 = vmatpush.bf16.msra.mxu2 %v362_v12  ;;  %v361_v13 = vld [vmem:[%s589_s5 + $0x30] sm:$0xff]  ;;  %v360_v14 = vld [vmem:[%s589_s5 + $0x28] sm:$0xff]  ;;  %v359_v15 = vld [vmem:[%s589_s5 + $0x20] sm:$0xff] }
  0x12   :  { %282 = vmatmul.msk.bf16.vlgmr.msra.gmra.mxu0 %vm76_vm1, %v70_v4  ;;  %168 = vmatpush.bf16.msra.mxu1 %v353_v5  ;;  %v358_v16 = vld [vmem:[%s589_s5 + $0x18] sm:$0xff]  ;;  %v357_v17 = vld [vmem:[%s589_s5 + $0x10] sm:$0xff]  ;;  %v367_v18 = vld [vmem:[#allocation5] ss:$0 sm:$0xff] }
  0x13   :  { %v356_v24 = vld [vmem:[%s589_s5 + $0x8] sm:$0xff]  ;;  %v355_v25 = vld [vmem:[%s589_s5] sm:$0xff] }
  0x14   :  { %v368_v26 = vld [vmem:[#allocation7] ss:$0 sm:$0xff]  ;;  %v369_v32 = vld [vmem:[%s590_s6] ss:$0 sm:$0xff] }
  0x15   :  { %251 = vmatpush.bf16.msra.mxu2 %v361_v13 }
  0x16   :  { %169 = vmatpush.bf16.msra.mxu1 %v352_v6 }
  0x19   :  { %252 = vmatpush.bf16.msra.mxu2 %v360_v14 }
  0x1a   :  { %170 = vmatpush.bf16.msra.mxu1 %v351_v7 }
  0x1d   :  { %253 = vmatpush.bf16.msra.mxu2 %v359_v15 }
  0x1e   :  { %171 = vmatpush.bf16.msra.mxu1 %v350_v8 }
  0x21   :  { %254 = vmatpush.bf16.msra.mxu2 %v358_v16 }
  0x22   :  { %172 = vmatpush.bf16.msra.mxu1 %v349_v9 }
  0x25   :  { %255 = vmatpush.bf16.msra.mxu2 %v357_v17 }
  0x26   :  { %173 = vmatpush.bf16.msra.mxu1 %v348_v10 }
  0x29   :  { %256 = vmatpush.bf16.msra.mxu2 %v356_v24 }
  0x2a   :  { %174 = vmatpush.bf16.msra.mxu1 %v347_v11 }
  0x2d   :  { %257 = vmatpush.bf16.msra.mxu2 %v355_v25 }
  0x8f   :  { %v93_v19 = vpop.f32.mrf.mxu0 }
  0x90   :  { %v94_v20 = vadd.f32 %v367_v18, %v93_v19 }
  0x92   :  { %v97_v21 = vmax.f32 %v94_v20, 0.0 }
  0x94   :  { %v98_v22 = vpack.c.bf16 %v97_v21, %v97_v21 }
  0x96   :  { %175 = vmatmul.bf16.vlgmr.msra.gmra.mxu1 %v98_v22 }
  0x97   :  { %v95_v23 = vpop.f32.mrf.mxu0 }
 0x113   :  { %v176_v27 = vpop.f32.mrf.mxu1 }
 0x114   :  { %v177_v28 = vadd.f32 %v368_v26, %v176_v27 }
 0x116   :  { %v180_v29 = vmax.f32 %v177_v28, 0.0 }
 0x118   :  { %v181_v30 = vpack.c.bf16 %v180_v29, %v180_v29 }
 0x11a   :  { %258 = vmatmul.bf16.vlgmr.msra.gmra.mxu2 %v181_v30 }
 0x11b   :  { %v178_v31 = vpop.f32.mrf.mxu1 }
 0x19d   :  { %v259_v33 = vpop.f32.mrf.mxu2 }
 0x19e   :  { %v260_v34 = vadd.f32 %v369_v32, %v259_v33 }
 0x1a0   :  { %263 = vst.msk [vmem:[#allocation8] sm:$0xff] %vm76_vm1, %v260_v34 }
 0x1a1   :  { %274 = dma.vmem_to_hbm [thread:$0]  %s270_s21, 128, %s272_s24, [#allocation4]  }
 0x1a5   :  { %v261_v35 = vpop.f32.mrf.mxu2 }
 0x1a6   :  { %470 = dma.done.wait [#allocation4], 128  }
 0x1a7   :  { %471 = vsyncadd [#allocation4], 4294967168 }
 0x1a8   :  { %279 = vsyncpa [#allocation3], 1 }
 0x1a9   :  { %280 = vsyncpa [#allocation6], 1 }
 0x1aa   :  { %281 = vsyncpa [#allocation4], 1 }

</bundles_post_ra>
